<compile_context>
chip_gen: v5e
topology: v5e:2x2
jax: 0.10.0
libtpu: 0.0.40
codegen_flags: <defaults>
</compile_context>

<pallas_src>
import jax
import jax.numpy as jnp
from jax.experimental import pallas as pl
from jax.experimental.pallas import tpu as pltpu

# ----- small-BERT config (bert-base values in comments) ---------------------
B, S   = 2, 8        # batch, max_length
D      = 32          # hidden size        (768)
NH     = 2           # attention heads    (12)
HD     = D // NH     # head dim           (64)
FF     = 64          # intermediate size  (3072)
L      = 2           # encoder layers     (12)
VOCAB  = 100         # vocab size         (30522)
MAXPOS = 16          # max positions      (512)
LN_EPS = 1e-12
M      = B * S       # tokens


# ----------------------------- fused encoder kernel -------------------------

def _ln(x, g, b):
    """LayerNorm over the last dim, f32 math."""
    mean = jnp.mean(x, axis=-1, keepdims=True)
    var = jnp.mean(jnp.square(x - mean), axis=-1, keepdims=True)
    return (x - mean) * jax.lax.rsqrt(var + LN_EPS) * g + b


def fused_encoder_kernel(emb_ref, bias_ref, emb_g_ref, emb_b_ref,
                         wqkv_ref, bqkv_ref, wo_ref, bo_ref,
                         ln1_g_ref, ln1_b_ref, w1_ref, b1_ref,
                         w2_ref, b2_ref, ln2_g_ref, ln2_b_ref,
                         out_ref, h_ref):
    """Grid = (L,). One grid step == one transformer layer.

    h_ref is a VMEM scratch holding the (M, D) hidden state across layers.
    Layer-`l` weights arrive as (1, ...) blocks of the stacked (L, ...) arrays.
    """
    lyr = pl.program_id(0)

    # ---- layer 0: embedding LayerNorm (no residual, no zeros input) ----
    @pl.when(lyr == 0)
    def _():
        h_ref[...] = _ln(emb_ref[...], emb_g_ref[...], emb_b_ref[...])

    h = h_ref[...]                                            # (M, D) f32

    # ---- fused QKV projection: bf16 operands, f32 accumulate ----
    qkv = jnp.dot(h.astype(jnp.bfloat16), wqkv_ref[0],
                  preferred_element_type=jnp.float32) + bqkv_ref[0]   # (M, 3D)
    q2 = qkv[:, 0 * D:1 * D]
    k2 = qkv[:, 1 * D:2 * D]
    v2 = qkv[:, 2 * D:3 * D]

    # ---- multi-head self-attention (all batches, heads unrolled) ----
    bias = bias_ref[...]                                      # (B, 1, S)
    scale = 1.0 / (HD ** 0.5)
    ctx_heads = []
    for hh in range(NH):                                      # NH is static
        sl = slice(hh * HD, (hh + 1) * HD)
        qh = q2[:, sl].reshape(B, S, HD)
        kh = k2[:, sl].reshape(B, S, HD)
        vh = v2[:, sl].reshape(B, S, HD)
        s = jnp.einsum('bqd,bkd->bqk', qh, kh,
                       preferred_element_type=jnp.float32) * scale    # (B,S,S)
        s = s + bias                                          # additive mask
        s = s - jnp.max(s, axis=-1, keepdims=True)
        p = jnp.exp(s)
        p = p * pl.reciprocal(jnp.sum(p, axis=-1, keepdims=True), approx=True)
        ch = jnp.einsum('bqk,bkd->bqd', p, vh,
                        preferred_element_type=jnp.float32)   # (B, S, HD)
        ctx_heads.append(ch.reshape(M, HD))
    ctx = jnp.concatenate(ctx_heads, axis=-1)                 # (M, D)

    # ---- attention output projection + residual + LN ----
    attn_out = jnp.dot(ctx.astype(jnp.bfloat16), wo_ref[0],
                       preferred_element_type=jnp.float32) + bo_ref[0]
    h = _ln(attn_out + h, ln1_g_ref[0], ln1_b_ref[0])

    # ---- FFN (GELU) + residual + LN ----
    ff = jnp.dot(h.astype(jnp.bfloat16), w1_ref[0],
                 preferred_element_type=jnp.float32) + b1_ref[0]
    # HF BERT uses exact erf GELU; tanh approximation used here for a
    # guaranteed TPU lowering.  Difference is negligible.
    ff = jax.nn.gelu(ff, approximate=True)
    ff = jnp.dot(ff.astype(jnp.bfloat16), w2_ref[0],
                 preferred_element_type=jnp.float32) + b2_ref[0]
    h = _ln(ff + h, ln2_g_ref[0], ln2_b_ref[0])

    h_ref[...] = h                                            # carry to next layer

    @pl.when(lyr == pl.num_programs(0) - 1)
    def _():
        out_ref[...] = h


def fused_encoder(emb, bias, p):
    """emb: (M, D) f32, bias: (B, 1, S) f32 -> (M, D) f32 final hidden states."""
    grid_spec = pltpu.PrefetchScalarGridSpec(
        num_scalar_prefetch=0,
        grid=(L,),
        in_specs=[
            pl.BlockSpec((M, D),        lambda l: (0, 0)),      # emb
            pl.BlockSpec((B, 1, S),     lambda l: (0, 0, 0)),   # mask bias
            pl.BlockSpec((1, D),        lambda l: (0, 0)),      # emb_ln_g
            pl.BlockSpec((1, D),        lambda l: (0, 0)),      # emb_ln_b
            pl.BlockSpec((1, D, 3 * D), lambda l: (l, 0, 0)),   # wqkv
            pl.BlockSpec((1, 1, 3 * D), lambda l: (l, 0, 0)),   # bqkv
            pl.BlockSpec((1, D, D),     lambda l: (l, 0, 0)),   # wo
            pl.BlockSpec((1, 1, D),     lambda l: (l, 0, 0)),   # bo
            pl.BlockSpec((1, 1, D),     lambda l: (l, 0, 0)),   # ln1_g
            pl.BlockSpec((1, 1, D),     lambda l: (l, 0, 0)),   # ln1_b
            pl.BlockSpec((1, D, FF),    lambda l: (l, 0, 0)),   # w1
            pl.BlockSpec((1, 1, FF),    lambda l: (l, 0, 0)),   # b1
            pl.BlockSpec((1, FF, D),    lambda l: (l, 0, 0)),   # w2
            pl.BlockSpec((1, 1, D),     lambda l: (l, 0, 0)),   # b2
            pl.BlockSpec((1, 1, D),     lambda l: (l, 0, 0)),   # ln2_g
            pl.BlockSpec((1, 1, D),     lambda l: (l, 0, 0)),   # ln2_b
        ],
        out_specs=pl.BlockSpec((M, D), lambda l: (0, 0)),       # resident output
        scratch_shapes=[pltpu.VMEM((M, D), jnp.float32)],       # hidden state h
    )
    return pl.pallas_call(
        fused_encoder_kernel,
        out_shape=jax.ShapeDtypeStruct((M, D), jnp.float32),
        grid_spec=grid_spec,
        compiler_params=pltpu.CompilerParams(
            # layer axis carries the hidden state through VMEM scratch
            dimension_semantics=("arbitrary",)),
    )(emb, bias, p["emb_ln_g"], p["emb_ln_b"],
      p["wqkv"], p["bqkv"], p["wo"], p["bo"],
      p["ln1_g"], p["ln1_b"], p["w1"], p["b1"],
      p["w2"], p["b2"], p["ln2_g"], p["ln2_b"])


# ----------------------------- parameters ------------------------------------

def init_params(key):
    def nrm(k, shape, scale=0.02, dtype=jnp.float32):
        return (scale * jax.random.normal(k, shape, dtype=jnp.float32)).astype(dtype)

    keys = jax.random.split(key, 16)
    it = iter(keys)
    p = {
        "word_emb": nrm(next(it), (VOCAB, D)),
        "pos_emb":  nrm(next(it), (MAXPOS, D)),
        "type_emb": nrm(next(it), (2, D)),
        "emb_ln_g": jnp.ones((1, D), jnp.float32),
        "emb_ln_b": jnp.zeros((1, D), jnp.float32),
        # Stacked per-layer weights.  Matmul operands stored bf16 (MXU-native
        # on v6e/v7x, halves weight DMA); biases / LN params stay f32.
        "wqkv": nrm(next(it), (L, D, 3 * D), dtype=jnp.bfloat16),
        "bqkv": jnp.zeros((L, 1, 3 * D), jnp.float32),
        "wo":   nrm(next(it), (L, D, D), dtype=jnp.bfloat16),
        "bo":   jnp.zeros((L, 1, D), jnp.float32),
        "ln1_g": jnp.ones((L, 1, D), jnp.float32),
        "ln1_b": jnp.zeros((L, 1, D), jnp.float32),
        "w1": nrm(next(it), (L, D, FF), dtype=jnp.bfloat16),
        "b1": jnp.zeros((L, 1, FF), jnp.float32),
        "w2": nrm(next(it), (L, FF, D), dtype=jnp.bfloat16),
        "b2": jnp.zeros((L, 1, D), jnp.float32),
        "ln2_g": jnp.ones((L, 1, D), jnp.float32),
        "ln2_b": jnp.zeros((L, 1, D), jnp.float32),
        # The nn.Sequential(Linear(D,50), ReLU, Linear(50,2)) classifier from
        # __init__ is initialized here for fidelity but — exactly like the
        # PyTorch forward() — it is never applied.
        "cls_w1": nrm(next(it), (D, 50)), "cls_b1": jnp.zeros((50,), jnp.float32),
        "cls_w2": nrm(next(it), (50, 2)), "cls_b2": jnp.zeros((2,), jnp.float32),
    }
    return p


# ----------------------------- forward ---------------------------------------

def bert_classifier_forward(params, input_ids, attention_mask):
    # --- embeddings: gather + adds are trivial XLA glue; LN runs in-kernel ---
    word = jnp.take(params["word_emb"], input_ids, axis=0)          # (B, S, D)
    pos = params["pos_emb"][:S][None, :, :]                         # (1, S, D)
    typ = params["type_emb"][0][None, None, :]                      # (1, 1, D)
    emb = (word + pos + typ).reshape(M, D).astype(jnp.float32)

    # --- extended additive attention-mask bias, broadcast over heads/queries ---
    bias = (1.0 - attention_mask.astype(jnp.float32)) * -10000.0    # (B, S)
    bias = bias[:, None, :]                                         # (B, 1, S)

    # --- single fused pallas_call for embedding-LN + all L encoder layers ---
    hidden = fused_encoder(emb, bias, params)                       # (M, D)

    last_hidden_state = hidden.reshape(B, S, D)
    last_hidden_state_cls = last_hidden_state[:, 0, :]              # (B, D)
    return last_hidden_state_cls


# ----------------------------- main -------------------------------------------

if __name__ == "__main__":
    key = jax.random.PRNGKey(0)
    kp, ki = jax.random.split(key)
    params = init_params(kp)

    input_ids = jax.random.randint(ki, (B, S), 0, VOCAB, dtype=jnp.int32)
    attention_mask = jnp.ones((B, S), dtype=jnp.int32)
    attention_mask = attention_mask.at[1, S - 2:].set(0)   # exercise masking

    fwd = jax.jit(bert_classifier_forward)
    out = fwd(params, input_ids, attention_mask)
    out = jax.block_until_ready(out)
    assert out.shape == (B, D) and out.dtype == jnp.float32
    print("KERNEL_OK")
</pallas_src>

<mosaic_0001>
module attributes {stable_mosaic.version = 11 : i64} {
  func.func @fused_encoder_kernel(%arg0: i32, %arg1: memref<16x32xf32, #tpu.memory_space<vmem>>, %arg2: memref<2x1x8xf32, #tpu.memory_space<vmem>>, %arg3: memref<1x32xf32, #tpu.memory_space<vmem>>, %arg4: memref<1x32xf32, #tpu.memory_space<vmem>>, %arg5: memref<1x32x96xbf16, #tpu.memory_space<vmem>>, %arg6: memref<1x1x96xf32, #tpu.memory_space<vmem>>, %arg7: memref<1x32x32xbf16, #tpu.memory_space<vmem>>, %arg8: memref<1x1x32xf32, #tpu.memory_space<vmem>>, %arg9: memref<1x1x32xf32, #tpu.memory_space<vmem>>, %arg10: memref<1x1x32xf32, #tpu.memory_space<vmem>>, %arg11: memref<1x32x64xbf16, #tpu.memory_space<vmem>>, %arg12: memref<1x1x64xf32, #tpu.memory_space<vmem>>, %arg13: memref<1x64x32xbf16, #tpu.memory_space<vmem>>, %arg14: memref<1x1x32xf32, #tpu.memory_space<vmem>>, %arg15: memref<1x1x32xf32, #tpu.memory_space<vmem>>, %arg16: memref<1x1x32xf32, #tpu.memory_space<vmem>>, %arg17: memref<16x32xf32, #tpu.memory_space<vmem>>, %arg18: memref<16x32xf32, #tpu.memory_space<vmem>>) attributes {dimension_semantics = [#tpu.dimension_semantics<arbitrary>], iteration_bounds = array<i64: 2>, scalar_prefetch = 0 : i64, scratch_operands = 1 : i64, tpu.core_type = #tpu.core_type<tc>, window_params = [{pipeline_mode = #tpu.pipeline_mode<synchronous>, transform_indices = @transform_0, window_bounds = array<i64: 16, 32>}, {pipeline_mode = #tpu.pipeline_mode<synchronous>, transform_indices = @transform_1, window_bounds = array<i64: 2, 1, 8>}, {pipeline_mode = #tpu.pipeline_mode<synchronous>, transform_indices = @transform_2, window_bounds = array<i64: 1, 32>}, {pipeline_mode = #tpu.pipeline_mode<synchronous>, transform_indices = @transform_3, window_bounds = array<i64: 1, 32>}, {transform_indices = @transform_4, window_bounds = array<i64: 1, 32, 96>}, {transform_indices = @transform_5, window_bounds = array<i64: 1, 1, 96>}, {transform_indices = @transform_6, window_bounds = array<i64: 1, 32, 32>}, {transform_indices = @transform_7, window_bounds = array<i64: 1, 1, 32>}, {transform_indices = @transform_8, window_bounds = array<i64: 1, 1, 32>}, {transform_indices = @transform_9, window_bounds = array<i64: 1, 1, 32>}, {transform_indices = @transform_10, window_bounds = array<i64: 1, 32, 64>}, {transform_indices = @transform_11, window_bounds = array<i64: 1, 1, 64>}, {transform_indices = @transform_12, window_bounds = array<i64: 1, 64, 32>}, {transform_indices = @transform_13, window_bounds = array<i64: 1, 1, 32>}, {transform_indices = @transform_14, window_bounds = array<i64: 1, 1, 32>}, {transform_indices = @transform_15, window_bounds = array<i64: 1, 1, 32>}, {pipeline_mode = #tpu.pipeline_mode<synchronous>, transform_indices = @transform_16, window_bounds = array<i64: 16, 32>}]} {
    %c0_i32 = arith.constant 0 : i32
    %0 = arith.cmpi eq, %arg0, %c0_i32 : i32
    %1 = arith.extui %0 : i1 to i32
    %c0_i32_0 = arith.constant 0 : i32
    %2 = arith.cmpi ne, %1, %c0_i32_0 : i32
    scf.if %2 {
      %c0_71 = arith.constant 0 : index
      %c0_72 = arith.constant 0 : index
      %158 = vector.load %arg1[%c0_71, %c0_72] : memref<16x32xf32, #tpu.memory_space<vmem>>, vector<16x32xf32>
      %c0_73 = arith.constant 0 : index
      %c0_74 = arith.constant 0 : index
      %159 = vector.load %arg3[%c0_73, %c0_74] : memref<1x32xf32, #tpu.memory_space<vmem>>, vector<1x32xf32>
      %c0_75 = arith.constant 0 : index
      %c0_76 = arith.constant 0 : index
      %160 = vector.load %arg4[%c0_75, %c0_76] : memref<1x32xf32, #tpu.memory_space<vmem>>, vector<1x32xf32>
      %cst_77 = arith.constant dense<0.000000e+00> : vector<16xf32>
      %161 = vector.multi_reduction <add>, %158, %cst_77 [1] : vector<16x32xf32> to vector<16xf32>
      %162 = vector.shape_cast %161 : vector<16xf32> to vector<16x1xf32>
      %cst_78 = arith.constant 3.200000e+01 : f32
      %163 = vector.broadcast %cst_78 : f32 to vector<16x1xf32>
      %164 = arith.divf %162, %163 : vector<16x1xf32>
      %165 = vector.broadcast %164 : vector<16x1xf32> to vector<16x32xf32>
      %166 = arith.subf %158, %165 : vector<16x32xf32>
      %167 = arith.mulf %166, %166 : vector<16x32xf32>
      %cst_79 = arith.constant dense<0.000000e+00> : vector<16xf32>
      %168 = vector.multi_reduction <add>, %167, %cst_79 [1] : vector<16x32xf32> to vector<16xf32>
      %169 = vector.shape_cast %168 : vector<16xf32> to vector<16x1xf32>
      %cst_80 = arith.constant 3.200000e+01 : f32
      %170 = vector.broadcast %cst_80 : f32 to vector<16x1xf32>
      %171 = arith.divf %169, %170 : vector<16x1xf32>
      %172 = vector.broadcast %164 : vector<16x1xf32> to vector<16x32xf32>
      %173 = arith.subf %158, %172 : vector<16x32xf32>
      %cst_81 = arith.constant 9.99999996E-13 : f32
      %174 = vector.broadcast %cst_81 : f32 to vector<16x1xf32>
      %175 = arith.addf %171, %174 : vector<16x1xf32>
      %176 = math.rsqrt %175 : vector<16x1xf32>
      %177 = vector.broadcast %176 : vector<16x1xf32> to vector<16x32xf32>
      %178 = arith.mulf %173, %177 : vector<16x32xf32>
      %179 = vector.broadcast %159 : vector<1x32xf32> to vector<16x32xf32>
      %180 = arith.mulf %178, %179 : vector<16x32xf32>
      %181 = vector.broadcast %160 : vector<1x32xf32> to vector<16x32xf32>
      %182 = arith.addf %180, %181 : vector<16x32xf32>
      %c0_82 = arith.constant 0 : index
      %c0_83 = arith.constant 0 : index
      %183 = vector.load %arg18[%c0_82, %c0_83] : memref<16x32xf32, #tpu.memory_space<vmem>>, vector<16x32xf32>
      tpu.vector_store %arg18[%c0_82, %c0_83], %182 {strides = array<i32>} : memref<16x32xf32, #tpu.memory_space<vmem>>, vector<16x32xf32>,
    } else {
    }
    %c0 = arith.constant 0 : index
    %c0_1 = arith.constant 0 : index
    %3 = vector.load %arg18[%c0, %c0_1] : memref<16x32xf32, #tpu.memory_space<vmem>>, vector<16x32xf32>
    %4 = arith.truncf %3 : vector<16x32xf32> to vector<16x32xbf16>
    %c0_2 = arith.constant 0 : index
    %c0_3 = arith.constant 0 : index
    %c0_4 = arith.constant 0 : index
    %5 = vector.load %arg5[%c0_2, %c0_3, %c0_4] : memref<1x32x96xbf16, #tpu.memory_space<vmem>>, vector<1x32x96xbf16>
    %6 = vector.shape_cast %5 : vector<1x32x96xbf16> to vector<32x96xbf16>
    %cst = arith.constant dense<0.000000e+00> : vector<16x96xf32>
    %7 = tpu.matmul %4, %6, %cst {dimension_numbers = #tpu.dot_dimension_numbers<[1], [0], [0], [1], [0, 0, 1, 1], [], []>} : vector<16x32xbf16>, vector<32x96xbf16>, vector<16x96xf32> -> vector<16x96xf32>
    %c0_5 = arith.constant 0 : index
    %c0_6 = arith.constant 0 : index
    %c0_7 = arith.constant 0 : index
    %8 = vector.load %arg6[%c0_5, %c0_6, %c0_7] : memref<1x1x96xf32, #tpu.memory_space<vmem>>, vector<1x1x96xf32>
    %9 = vector.shape_cast %8 : vector<1x1x96xf32> to vector<1x96xf32>
    %10 = vector.broadcast %9 : vector<1x96xf32> to vector<16x96xf32>
    %11 = arith.addf %7, %10 : vector<16x96xf32>
    %12 = vector.extract_strided_slice %11 {offsets = [0, 0], sizes = [16, 32], strides = [1, 1]} : vector<16x96xf32> to vector<16x32xf32>
    %13 = vector.extract_strided_slice %11 {offsets = [0, 32], sizes = [16, 32], strides = [1, 1]} : vector<16x96xf32> to vector<16x32xf32>
    %14 = vector.extract_strided_slice %11 {offsets = [0, 64], sizes = [16, 32], strides = [1, 1]} : vector<16x96xf32> to vector<16x32xf32>
    %c0_8 = arith.constant 0 : index
    %c0_9 = arith.constant 0 : index
    %c0_10 = arith.constant 0 : index
    %15 = vector.load %arg2[%c0_8, %c0_9, %c0_10] : memref<2x1x8xf32, #tpu.memory_space<vmem>>, vector<2x1x8xf32>
    %16 = vector.extract_strided_slice %12 {offsets = [0, 0], sizes = [16, 16], strides = [1, 1]} : vector<16x32xf32> to vector<16x16xf32>
    %17 = vector.shape_cast %16 : vector<16x16xf32> to vector<2x8x16xf32>
    %18 = vector.extract_strided_slice %13 {offsets = [0, 0], sizes = [16, 16], strides = [1, 1]} : vector<16x32xf32> to vector<16x16xf32>
    %19 = vector.shape_cast %18 : vector<16x16xf32> to vector<2x8x16xf32>
    %20 = vector.extract_strided_slice %14 {offsets = [0, 0], sizes = [16, 16], strides = [1, 1]} : vector<16x32xf32> to vector<16x16xf32>
    %21 = vector.shape_cast %20 : vector<16x16xf32> to vector<2x8x16xf32>
    "tpu.trace_start"() <{level = 10 : i32, message = "bqd,bkd->bqk"}> : () -> ()
    %cst_11 = arith.constant dense<0.000000e+00> : vector<2x8x8xf32>
    %22 = tpu.matmul %17, %19, %cst_11 {dimension_numbers = #tpu.dot_dimension_numbers<[2], [2], [1], [1], [0, 0, 0, 1, 1, 1], [0], [0]>} : vector<2x8x16xf32>, vector<2x8x16xf32>, vector<2x8x8xf32> -> vector<2x8x8xf32>
    "tpu.trace_stop"() : () -> ()
    %cst_12 = arith.constant 2.500000e-01 : f32
    %23 = vector.broadcast %cst_12 : f32 to vector<2x8x8xf32>
    %24 = arith.mulf %22, %23 : vector<2x8x8xf32>
    %25 = vector.broadcast %15 : vector<2x1x8xf32> to vector<2x8x8xf32>
    %26 = arith.addf %24, %25 : vector<2x8x8xf32>
    %cst_13 = arith.constant dense<0xFF800000> : vector<2x8xf32>
    %27 = vector.multi_reduction <maximumf>, %26, %cst_13 [2] : vector<2x8x8xf32> to vector<2x8xf32>
    %28 = vector.shape_cast %27 : vector<2x8xf32> to vector<2x8x1xf32>
    %29 = vector.broadcast %28 : vector<2x8x1xf32> to vector<2x8x8xf32>
    %30 = arith.subf %26, %29 : vector<2x8x8xf32>
    %31 = math.exp %30 : vector<2x8x8xf32>
    %cst_14 = arith.constant dense<0.000000e+00> : vector<2x8xf32>
    %32 = vector.multi_reduction <add>, %31, %cst_14 [2] : vector<2x8x8xf32> to vector<2x8xf32>
    %33 = vector.shape_cast %32 : vector<2x8xf32> to vector<2x8x1xf32>
    %34 = tpu.reciprocal %33 {approx = true} : vector<2x8x1xf32> -> vector<2x8x1xf32>
    %35 = vector.broadcast %34 : vector<2x8x1xf32> to vector<2x8x8xf32>
    %36 = arith.mulf %31, %35 : vector<2x8x8xf32>
    "tpu.trace_start"() <{level = 10 : i32, message = "bqk,bkd->bqd"}> : () -> ()
    %cst_15 = arith.constant dense<0.000000e+00> : vector<2x8x16xf32>
    %37 = tpu.matmul %36, %21, %cst_15 {dimension_numbers = #tpu.dot_dimension_numbers<[2], [1], [1], [2], [0, 0, 0, 1, 1, 2], [0], [0]>} : vector<2x8x8xf32>, vector<2x8x16xf32>, vector<2x8x16xf32> -> vector<2x8x16xf32>
    "tpu.trace_stop"() : () -> ()
    %38 = vector.shape_cast %37 : vector<2x8x16xf32> to vector<16x16xf32>
    %39 = vector.extract_strided_slice %12 {offsets = [0, 16], sizes = [16, 16], strides = [1, 1]} : vector<16x32xf32> to vector<16x16xf32>
    %40 = vector.shape_cast %39 : vector<16x16xf32> to vector<2x8x16xf32>
    %41 = vector.extract_strided_slice %13 {offsets = [0, 16], sizes = [16, 16], strides = [1, 1]} : vector<16x32xf32> to vector<16x16xf32>
    %42 = vector.shape_cast %41 : vector<16x16xf32> to vector<2x8x16xf32>
    %43 = vector.extract_strided_slice %14 {offsets = [0, 16], sizes = [16, 16], strides = [1, 1]} : vector<16x32xf32> to vector<16x16xf32>
    %44 = vector.shape_cast %43 : vector<16x16xf32> to vector<2x8x16xf32>
    "tpu.trace_start"() <{level = 10 : i32, message = "bqd,bkd->bqk"}> : () -> ()
    %cst_16 = arith.constant dense<0.000000e+00> : vector<2x8x8xf32>
    %45 = tpu.matmul %40, %42, %cst_16 {dimension_numbers = #tpu.dot_dimension_numbers<[2], [2], [1], [1], [0, 0, 0, 1, 1, 1], [0], [0]>} : vector<2x8x16xf32>, vector<2x8x16xf32>, vector<2x8x8xf32> -> vector<2x8x8xf32>
    "tpu.trace_stop"() : () -> ()
    %cst_17 = arith.constant 2.500000e-01 : f32
    %46 = vector.broadcast %cst_17 : f32 to vector<2x8x8xf32>
    %47 = arith.mulf %45, %46 : vector<2x8x8xf32>
    %48 = vector.broadcast %15 : vector<2x1x8xf32> to vector<2x8x8xf32>
    %49 = arith.addf %47, %48 : vector<2x8x8xf32>
    %cst_18 = arith.constant dense<0xFF800000> : vector<2x8xf32>
    %50 = vector.multi_reduction <maximumf>, %49, %cst_18 [2] : vector<2x8x8xf32> to vector<2x8xf32>
    %51 = vector.shape_cast %50 : vector<2x8xf32> to vector<2x8x1xf32>
    %52 = vector.broadcast %51 : vector<2x8x1xf32> to vector<2x8x8xf32>
    %53 = arith.subf %49, %52 : vector<2x8x8xf32>
    %54 = math.exp %53 : vector<2x8x8xf32>
    %cst_19 = arith.constant dense<0.000000e+00> : vector<2x8xf32>
    %55 = vector.multi_reduction <add>, %54, %cst_19 [2] : vector<2x8x8xf32> to vector<2x8xf32>
    %56 = vector.shape_cast %55 : vector<2x8xf32> to vector<2x8x1xf32>
    %57 = tpu.reciprocal %56 {approx = true} : vector<2x8x1xf32> -> vector<2x8x1xf32>
    %58 = vector.broadcast %57 : vector<2x8x1xf32> to vector<2x8x8xf32>
    %59 = arith.mulf %54, %58 : vector<2x8x8xf32>
    "tpu.trace_start"() <{level = 10 : i32, message = "bqk,bkd->bqd"}> : () -> ()
    %cst_20 = arith.constant dense<0.000000e+00> : vector<2x8x16xf32>
    %60 = tpu.matmul %59, %44, %cst_20 {dimension_numbers = #tpu.dot_dimension_numbers<[2], [1], [1], [2], [0, 0, 0, 1, 1, 2], [0], [0]>} : vector<2x8x8xf32>, vector<2x8x16xf32>, vector<2x8x16xf32> -> vector<2x8x16xf32>
    "tpu.trace_stop"() : () -> ()
    %61 = vector.shape_cast %60 : vector<2x8x16xf32> to vector<16x16xf32>
    %62 = tpu.concatenate %38, %61 in 1 : vector<16x16xf32>, vector<16x16xf32> -> vector<16x32xf32>
    %63 = arith.truncf %62 : vector<16x32xf32> to vector<16x32xbf16>
    %c0_21 = arith.constant 0 : index
    %c0_22 = arith.constant 0 : index
    %c0_23 = arith.constant 0 : index
    %64 = vector.load %arg7[%c0_21, %c0_22, %c0_23] : memref<1x32x32xbf16, #tpu.memory_space<vmem>>, vector<1x32x32xbf16>
    %65 = vector.shape_cast %64 : vector<1x32x32xbf16> to vector<32x32xbf16>
    %cst_24 = arith.constant dense<0.000000e+00> : vector<16x32xf32>
    %66 = tpu.matmul %63, %65, %cst_24 {dimension_numbers = #tpu.dot_dimension_numbers<[1], [0], [0], [1], [0, 0, 1, 1], [], []>} : vector<16x32xbf16>, vector<32x32xbf16>, vector<16x32xf32> -> vector<16x32xf32>
    %c0_25 = arith.constant 0 : index
    %c0_26 = arith.constant 0 : index
    %c0_27 = arith.constant 0 : index
    %67 = vector.load %arg8[%c0_25, %c0_26, %c0_27] : memref<1x1x32xf32, #tpu.memory_space<vmem>>, vector<1x1x32xf32>
    %68 = vector.shape_cast %67 : vector<1x1x32xf32> to vector<1x32xf32>
    %69 = vector.broadcast %68 : vector<1x32xf32> to vector<16x32xf32>
    %70 = arith.addf %66, %69 : vector<16x32xf32>
    %71 = arith.addf %70, %3 : vector<16x32xf32>
    %c0_28 = arith.constant 0 : index
    %c0_29 = arith.constant 0 : index
    %c0_30 = arith.constant 0 : index
    %72 = vector.load %arg9[%c0_28, %c0_29, %c0_30] : memref<1x1x32xf32, #tpu.memory_space<vmem>>, vector<1x1x32xf32>
    %73 = vector.shape_cast %72 : vector<1x1x32xf32> to vector<1x32xf32>
    %c0_31 = arith.constant 0 : index
    %c0_32 = arith.constant 0 : index
    %c0_33 = arith.constant 0 : index
    %74 = vector.load %arg10[%c0_31, %c0_32, %c0_33] : memref<1x1x32xf32, #tpu.memory_space<vmem>>, vector<1x1x32xf32>
    %75 = vector.shape_cast %74 : vector<1x1x32xf32> to vector<1x32xf32>
    %cst_34 = arith.constant dense<0.000000e+00> : vector<16xf32>
    %76 = vector.multi_reduction <add>, %71, %cst_34 [1] : vector<16x32xf32> to vector<16xf32>
    %77 = vector.shape_cast %76 : vector<16xf32> to vector<16x1xf32>
    %cst_35 = arith.constant 3.200000e+01 : f32
    %78 = vector.broadcast %cst_35 : f32 to vector<16x1xf32>
    %79 = arith.divf %77, %78 : vector<16x1xf32>
    %80 = vector.broadcast %79 : vector<16x1xf32> to vector<16x32xf32>
    %81 = arith.subf %71, %80 : vector<16x32xf32>
    %82 = arith.mulf %81, %81 : vector<16x32xf32>
    %cst_36 = arith.constant dense<0.000000e+00> : vector<16xf32>
    %83 = vector.multi_reduction <add>, %82, %cst_36 [1] : vector<16x32xf32> to vector<16xf32>
    %84 = vector.shape_cast %83 : vector<16xf32> to vector<16x1xf32>
    %cst_37 = arith.constant 3.200000e+01 : f32
    %85 = vector.broadcast %cst_37 : f32 to vector<16x1xf32>
    %86 = arith.divf %84, %85 : vector<16x1xf32>
    %87 = vector.broadcast %79 : vector<16x1xf32> to vector<16x32xf32>
    %88 = arith.subf %71, %87 : vector<16x32xf32>
    %cst_38 = arith.constant 9.99999996E-13 : f32
    %89 = vector.broadcast %cst_38 : f32 to vector<16x1xf32>
    %90 = arith.addf %86, %89 : vector<16x1xf32>
    %91 = math.rsqrt %90 : vector<16x1xf32>
    %92 = vector.broadcast %91 : vector<16x1xf32> to vector<16x32xf32>
    %93 = arith.mulf %88, %92 : vector<16x32xf32>
    %94 = vector.broadcast %73 : vector<1x32xf32> to vector<16x32xf32>
    %95 = arith.mulf %93, %94 : vector<16x32xf32>
    %96 = vector.broadcast %75 : vector<1x32xf32> to vector<16x32xf32>
    %97 = arith.addf %95, %96 : vector<16x32xf32>
    %98 = arith.truncf %97 : vector<16x32xf32> to vector<16x32xbf16>
    %c0_39 = arith.constant 0 : index
    %c0_40 = arith.constant 0 : index
    %c0_41 = arith.constant 0 : index
    %99 = vector.load %arg11[%c0_39, %c0_40, %c0_41] : memref<1x32x64xbf16, #tpu.memory_space<vmem>>, vector<1x32x64xbf16>
    %100 = vector.shape_cast %99 : vector<1x32x64xbf16> to vector<32x64xbf16>
    %cst_42 = arith.constant dense<0.000000e+00> : vector<16x64xf32>
    %101 = tpu.matmul %98, %100, %cst_42 {dimension_numbers = #tpu.dot_dimension_numbers<[1], [0], [0], [1], [0, 0, 1, 1], [], []>} : vector<16x32xbf16>, vector<32x64xbf16>, vector<16x64xf32> -> vector<16x64xf32>
    %c0_43 = arith.constant 0 : index
    %c0_44 = arith.constant 0 : index
    %c0_45 = arith.constant 0 : index
    %102 = vector.load %arg12[%c0_43, %c0_44, %c0_45] : memref<1x1x64xf32, #tpu.memory_space<vmem>>, vector<1x1x64xf32>
    %103 = vector.shape_cast %102 : vector<1x1x64xf32> to vector<1x64xf32>
    %104 = vector.broadcast %103 : vector<1x64xf32> to vector<16x64xf32>
    %105 = arith.addf %101, %104 : vector<16x64xf32>
    %106 = arith.mulf %105, %105 : vector<16x64xf32>
    %107 = arith.mulf %105, %106 : vector<16x64xf32>
    %cst_46 = arith.constant 4.471500e-02 : f32
    %108 = vector.broadcast %cst_46 : f32 to vector<16x64xf32>
    %109 = arith.mulf %108, %107 : vector<16x64xf32>
    %110 = arith.addf %105, %109 : vector<16x64xf32>
    %cst_47 = arith.constant 0.797884583 : f32
    %111 = vector.broadcast %cst_47 : f32 to vector<16x64xf32>
    %112 = arith.mulf %111, %110 : vector<16x64xf32>
    %113 = math.tanh %112 : vector<16x64xf32>
    %cst_48 = arith.constant 1.000000e+00 : f32
    %114 = vector.broadcast %cst_48 : f32 to vector<16x64xf32>
    %115 = arith.addf %114, %113 : vector<16x64xf32>
    %cst_49 = arith.constant 5.000000e-01 : f32
    %116 = vector.broadcast %cst_49 : f32 to vector<16x64xf32>
    %117 = arith.mulf %116, %115 : vector<16x64xf32>
    %118 = arith.mulf %105, %117 : vector<16x64xf32>
    %119 = arith.truncf %118 : vector<16x64xf32> to vector<16x64xbf16>
    %c0_50 = arith.constant 0 : index
    %c0_51 = arith.constant 0 : index
    %c0_52 = arith.constant 0 : index
    %120 = vector.load %arg13[%c0_50, %c0_51, %c0_52] : memref<1x64x32xbf16, #tpu.memory_space<vmem>>, vector<1x64x32xbf16>
    %121 = vector.shape_cast %120 : vector<1x64x32xbf16> to vector<64x32xbf16>
    %cst_53 = arith.constant dense<0.000000e+00> : vector<16x32xf32>
    %122 = tpu.matmul %119, %121, %cst_53 {dimension_numbers = #tpu.dot_dimension_numbers<[1], [0], [0], [1], [0, 0, 1, 1], [], []>} : vector<16x64xbf16>, vector<64x32xbf16>, vector<16x32xf32> -> vector<16x32xf32>
    %c0_54 = arith.constant 0 : index
    %c0_55 = arith.constant 0 : index
    %c0_56 = arith.constant 0 : index
    %123 = vector.load %arg14[%c0_54, %c0_55, %c0_56] : memref<1x1x32xf32, #tpu.memory_space<vmem>>, vector<1x1x32xf32>
    %124 = vector.shape_cast %123 : vector<1x1x32xf32> to vector<1x32xf32>
    %125 = vector.broadcast %124 : vector<1x32xf32> to vector<16x32xf32>
    %126 = arith.addf %122, %125 : vector<16x32xf32>
    %127 = arith.addf %126, %97 : vector<16x32xf32>
    %c0_57 = arith.constant 0 : index
    %c0_58 = arith.constant 0 : index
    %c0_59 = arith.constant 0 : index
    %128 = vector.load %arg15[%c0_57, %c0_58, %c0_59] : memref<1x1x32xf32, #tpu.memory_space<vmem>>, vector<1x1x32xf32>
    %129 = vector.shape_cast %128 : vector<1x1x32xf32> to vector<1x32xf32>
    %c0_60 = arith.constant 0 : index
    %c0_61 = arith.constant 0 : index
    %c0_62 = arith.constant 0 : index
    %130 = vector.load %arg16[%c0_60, %c0_61, %c0_62] : memref<1x1x32xf32, #tpu.memory_space<vmem>>, vector<1x1x32xf32>
    %131 = vector.shape_cast %130 : vector<1x1x32xf32> to vector<1x32xf32>
    %cst_63 = arith.constant dense<0.000000e+00> : vector<16xf32>
    %132 = vector.multi_reduction <add>, %127, %cst_63 [1] : vector<16x32xf32> to vector<16xf32>
    %133 = vector.shape_cast %132 : vector<16xf32> to vector<16x1xf32>
    %cst_64 = arith.constant 3.200000e+01 : f32
    %134 = vector.broadcast %cst_64 : f32 to vector<16x1xf32>
    %135 = arith.divf %133, %134 : vector<16x1xf32>
    %136 = vector.broadcast %135 : vector<16x1xf32> to vector<16x32xf32>
    %137 = arith.subf %127, %136 : vector<16x32xf32>
    %138 = arith.mulf %137, %137 : vector<16x32xf32>
    %cst_65 = arith.constant dense<0.000000e+00> : vector<16xf32>
    %139 = vector.multi_reduction <add>, %138, %cst_65 [1] : vector<16x32xf32> to vector<16xf32>
    %140 = vector.shape_cast %139 : vector<16xf32> to vector<16x1xf32>
    %cst_66 = arith.constant 3.200000e+01 : f32
    %141 = vector.broadcast %cst_66 : f32 to vector<16x1xf32>
    %142 = arith.divf %140, %141 : vector<16x1xf32>
    %143 = vector.broadcast %135 : vector<16x1xf32> to vector<16x32xf32>
    %144 = arith.subf %127, %143 : vector<16x32xf32>
    %cst_67 = arith.constant 9.99999996E-13 : f32
    %145 = vector.broadcast %cst_67 : f32 to vector<16x1xf32>
    %146 = arith.addf %142, %145 : vector<16x1xf32>
    %147 = math.rsqrt %146 : vector<16x1xf32>
    %148 = vector.broadcast %147 : vector<16x1xf32> to vector<16x32xf32>
    %149 = arith.mulf %144, %148 : vector<16x32xf32>
    %150 = vector.broadcast %129 : vector<1x32xf32> to vector<16x32xf32>
    %151 = arith.mulf %149, %150 : vector<16x32xf32>
    %152 = vector.broadcast %131 : vector<1x32xf32> to vector<16x32xf32>
    %153 = arith.addf %151, %152 : vector<16x32xf32>
    %c0_68 = arith.constant 0 : index
    %c0_69 = arith.constant 0 : index
    %154 = vector.load %arg18[%c0_68, %c0_69] : memref<16x32xf32, #tpu.memory_space<vmem>>, vector<16x32xf32>
    tpu.vector_store %arg18[%c0_68, %c0_69], %153 {strides = array<i32>} : memref<16x32xf32, #tpu.memory_space<vmem>>, vector<16x32xf32>,
    %c1_i32 = arith.constant 1 : i32
    %155 = arith.cmpi eq, %arg0, %c1_i32 : i32
    %156 = arith.extui %155 : i1 to i32
    %c0_i32_70 = arith.constant 0 : i32
    %157 = arith.cmpi ne, %156, %c0_i32_70 : i32
    scf.if %157 {
      %c0_71 = arith.constant 0 : index
      %c0_72 = arith.constant 0 : index
      %158 = vector.load %arg17[%c0_71, %c0_72] : memref<16x32xf32, #tpu.memory_space<vmem>>, vector<16x32xf32>
      tpu.vector_store %arg17[%c0_71, %c0_72], %153 {strides = array<i32>} : memref<16x32xf32, #tpu.memory_space<vmem>>, vector<16x32xf32>,
    } else {
    }
    return
  }
  func.func @transform_0(%arg0: i32) -> (i32, i32) {
    %c0_i32 = arith.constant 0 : i32
    %c0_i32_0 = arith.constant 0 : i32
    %c0_i32_1 = arith.constant 0 : i32
    return %c0_i32, %c0_i32_0 : i32, i32
  }
  func.func @transform_1(%arg0: i32) -> (i32, i32, i32) {
    %c0_i32 = arith.constant 0 : i32
    %c0_i32_0 = arith.constant 0 : i32
    %c0_i32_1 = arith.constant 0 : i32
    %c0_i32_2 = arith.constant 0 : i32
    return %c0_i32, %c0_i32_0, %c0_i32_1 : i32, i32, i32
  }
  func.func @transform_2(%arg0: i32) -> (i32, i32) {
    %c0_i32 = arith.constant 0 : i32
    %c0_i32_0 = arith.constant 0 : i32
    %c0_i32_1 = arith.constant 0 : i32
    return %c0_i32, %c0_i32_0 : i32, i32
  }
  func.func @transform_3(%arg0: i32) -> (i32, i32) {
    %c0_i32 = arith.constant 0 : i32
    %c0_i32_0 = arith.constant 0 : i32
    %c0_i32_1 = arith.constant 0 : i32
    return %c0_i32, %c0_i32_0 : i32, i32
  }
  func.func @transform_4(%arg0: i32) -> (i32, i32, i32) {
    %c0_i32 = arith.constant 0 : i32
    %c0_i32_0 = arith.constant 0 : i32
    %c0_i32_1 = arith.constant 0 : i32
    return %arg0, %c0_i32, %c0_i32_0 : i32, i32, i32
  }
  func.func @transform_5(%arg0: i32) -> (i32, i32, i32) {
    %c0_i32 = arith.constant 0 : i32
    %c0_i32_0 = arith.constant 0 : i32
    %c0_i32_1 = arith.constant 0 : i32
    return %arg0, %c0_i32, %c0_i32_0 : i32, i32, i32
  }
  func.func @transform_6(%arg0: i32) -> (i32, i32, i32) {
    %c0_i32 = arith.constant 0 : i32
    %c0_i32_0 = arith.constant 0 : i32
    %c0_i32_1 = arith.constant 0 : i32
    return %arg0, %c0_i32, %c0_i32_0 : i32, i32, i32
  }
  func.func @transform_7(%arg0: i32) -> (i32, i32, i32) {
    %c0_i32 = arith.constant 0 : i32
    %c0_i32_0 = arith.constant 0 : i32
    %c0_i32_1 = arith.constant 0 : i32
    return %arg0, %c0_i32, %c0_i32_0 : i32, i32, i32
  }
  func.func @transform_8(%arg0: i32) -> (i32, i32, i32) {
    %c0_i32 = arith.constant 0 : i32
    %c0_i32_0 = arith.constant 0 : i32
    %c0_i32_1 = arith.constant 0 : i32
    return %arg0, %c0_i32, %c0_i32_0 : i32, i32, i32
  }
  func.func @transform_9(%arg0: i32) -> (i32, i32, i32) {
    %c0_i32 = arith.constant 0 : i32
    %c0_i32_0 = arith.constant 0 : i32
    %c0_i32_1 = arith.constant 0 : i32
    return %arg0, %c0_i32, %c0_i32_0 : i32, i32, i32
  }
  func.func @transform_10(%arg0: i32) -> (i32, i32, i32) {
    %c0_i32 = arith.constant 0 : i32
    %c0_i32_0 = arith.constant 0 : i32
    %c0_i32_1 = arith.constant 0 : i32
    return %arg0, %c0_i32, %c0_i32_0 : i32, i32, i32
  }
  func.func @transform_11(%arg0: i32) -> (i32, i32, i32) {
    %c0_i32 = arith.constant 0 : i32
    %c0_i32_0 = arith.constant 0 : i32
    %c0_i32_1 = arith.constant 0 : i32
    return %arg0, %c0_i32, %c0_i32_0 : i32, i32, i32
  }
  func.func @transform_12(%arg0: i32) -> (i32, i32, i32) {
    %c0_i32 = arith.constant 0 : i32
    %c0_i32_0 = arith.constant 0 : i32
    %c0_i32_1 = arith.constant 0 : i32
    return %arg0, %c0_i32, %c0_i32_0 : i32, i32, i32
  }
  func.func @transform_13(%arg0: i32) -> (i32, i32, i32) {
    %c0_i32 = arith.constant 0 : i32
    %c0_i32_0 = arith.constant 0 : i32
    %c0_i32_1 = arith.constant 0 : i32
    return %arg0, %c0_i32, %c0_i32_0 : i32, i32, i32
  }
  func.func @transform_14(%arg0: i32) -> (i32, i32, i32) {
    %c0_i32 = arith.constant 0 : i32
    %c0_i32_0 = arith.constant 0 : i32
    %c0_i32_1 = arith.constant 0 : i32
    return %arg0, %c0_i32, %c0_i32_0 : i32, i32, i32
  }
  func.func @transform_15(%arg0: i32) -> (i32, i32, i32) {
    %c0_i32 = arith.constant 0 : i32
    %c0_i32_0 = arith.constant 0 : i32
    %c0_i32_1 = arith.constant 0 : i32
    return %arg0, %c0_i32, %c0_i32_0 : i32, i32, i32
  }
  func.func @transform_16(%arg0: i32) -> (i32, i32) {
    %c0_i32 = arith.constant 0 : i32
    %c0_i32_0 = arith.constant 0 : i32
    %c0_i32_1 = arith.constant 0 : i32
    return %c0_i32, %c0_i32_0 : i32, i32
  }
}

</mosaic_0001>

<bundles_post_ra>
// kernel: bert_classifier_forward.1
= control target key start
LH: loop header
LB: loop body
LE: loop exit
PB: predicated region body
PF: predicated region fallthrough
CT: control target
= control target key end

     0   :  { %s1751_s21 = smov 0   ;;  %s1982_s0 = inlined_call_operand.vmem [shape: f32[16,32], index: 0, kind: input, shape index: {}]   ;;  %s1983_s1 = inlined_call_operand.vmem [shape: f32[2,1,8], index: 1, kind: input, shape index: {}]   ;;  %s1984_s2 = inlined_call_operand.vmem [shape: f32[1,32], index: 2, kind: input, shape index: {}]   ;;  %s1985_s3 = inlined_call_operand.vmem [shape: f32[1,32], index: 3, kind: input, shape index: {}]   ;;  %s1986_s4 = inlined_call_operand.vmem [shape: bf16[2,32,96], index: 4, kind: input, shape index: {}]   ;;  %s1987_s5 = inlined_call_operand.vmem [shape: f32[2,1,96], index: 5, kind: input, shape index: {}]   ;;  %s1988_s6 = inlined_call_operand.vmem [shape: bf16[2,32,32], index: 6, kind: input, shape index: {}]   ;;  %s1989_s7 = inlined_call_operand.vmem [shape: f32[2,1,32], index: 7, kind: input, shape index: {}]   ;;  %s1990_s8 = inlined_call_operand.vmem [shape: f32[2,1,32], index: 8, kind: input, shape index: {}]   ;;  %s1991_s9 = inlined_call_operand.vmem [shape: f32[2,1,32], index: 9, kind: input, shape index: {}]   ;;  %s1992_s10 = inlined_call_operand.vmem [shape: bf16[2,32,64], index: 10, kind: input, shape index: {}]   ;;  %s1993_s11 = inlined_call_operand.vmem [shape: f32[2,1,64], index: 11, kind: input, shape index: {}]   ;;  %s1994_s12 = inlined_call_operand.vmem [shape: bf16[2,64,32], index: 12, kind: input, shape index: {}]   ;;  %s1995_s13 = inlined_call_operand.vmem [shape: f32[2,1,32], index: 13, kind: input, shape index: {}]   ;;  %s1996_s14 = inlined_call_operand.vmem [shape: f32[2,1,32], index: 14, kind: input, shape index: {}]   ;;  %s1997_s15 = inlined_call_operand.vmem [shape: f32[2,1,32], index: 15, kind: input, shape index: {}]   ;;  %s1998_s16 = inlined_call_operand.vmem [shape: f32[16,32], index: 16, kind: output, shape index: {}]  }
   0x1   :  { %2004 = sst [smem:[#allocation5_spill]] %s1982_s0 }
   0x2   :  { %2005 = sst [smem:[#allocation6_spill]] %s1983_s1 }
   0x3   :  { %2006 = sst [smem:[#allocation7_spill]] %s1985_s3 }
   0x4   :  { %2007 = sst [smem:[#allocation8_spill]] %s1986_s4 }
   0x5   :  { %2008 = sst [smem:[#allocation9_spill]] %s1988_s6 }
   0x6   :  { %2009 = sst [smem:[#allocation10_spill]] %s1998_s16 }
   0x7 LB: > { %2010 = sst [smem:[#allocation3_spill]] %s1656_s21  ;;  %s1757_s22 = sadd.s32 4294967295, %s1656_s21   ;;  %s1656_s21 = sphi %s1751_s21, %s26_s21  }
   0x8   : > { %p1498_p0 = scmp.ge.s32.totalorder %s1656_s21, 1  ;;  %p551_p1 = scmp.lt.s32.totalorder %s1656_s21, 3 }
   0xa   : > { %p552_p2 = pnand %p1498_p0, %p551_p1 }
   0xc   : > { %555 = sbr.rel (%p552_p2) target bundleno = 2627 (0xa43), region = 84 }
  0x11   : > { %p635_p3 = scmp.lt.s32.totalorder %s1757_s22, 1  ;;  %s2011_s4 = sld [smem:[#allocation8_spill]] }
  0x12   : > { %s2012_s6 = sld [smem:[#allocation9_spill]]  ;;  %p1507_p4 = scmp.ne.s32.totalorder %s1757_s22, 0 }
  0x13   : > { %s1763_s23 = scalar_select %p635_p3, %s1757_s22, 1 }
  0x14   : > { %s2014_s19 = sld [smem:[#allocation5_spill]] (!%p1507_p4) }
  0x15   : > { %s1567_s24 = sshll.u32 %s1763_s23, 4  ;;  %s672_s25 = scalar_lea.vmem %s1995_s13, %s1763_s23 }
  0x16   : > { %s675_s28 = scalar_lea.vmem %s1996_s14, %s1763_s23  ;;  %s678_s3 = scalar_lea.vmem %s1997_s15, %s1763_s23 }
  0x17   : > { %s1773_s30 = scalar_lea.vmem %s2011_s4, %s1567_s24  ;;  %s1795_s4 = scalar_lea.vmem %s1992_s10, %s1567_s24 }
  0x18   : > { %s1778_s18 = scalar_lea.vmem %s2012_s6, %s1567_s24  ;;  %s664_s6 = scalar_lea.vmem %s1993_s11, %s1763_s23 }
  0x19   : > { %2013 = sst [smem:[#allocation4_spill]] %s1778_s18  ;;  %s1570_s18 = sshll.u32 %s1763_s23, 5 }
  0x1a   : > { %s1805_s21 = scalar_lea.vmem %s1994_s12, %s1570_s18  ;;  %683 = sbr.rel (%p1507_p4) target bundleno = 309 (0x135), region = 88 }
  0x1b   : > { %s2015_s24 = sld [smem:[#allocation7_spill]] (!%p1507_p4) }
  0x1f   : > { %v684_v0 = vld [vmem:[%s2014_s19] sm:$0xff]  ;;  %vm688_vm0 = vcmask 261120   ;;  %v685_v2 = vld [vmem:[%s2014_s19 + $0x8] sm:$0xff]  ;;  %v1658_v4 = vmov 32.0  }
  0x20   : > { %v689_v1 = vsel %vm688_vm0, %v684_v0, 0.0  ;;  %v692_v3 = vsel %vm688_vm0, %v685_v2, 0.0  ;;  %1599 = vrcp.f32 %v1658_v4  ;;  %v1597_v35 = vld [vmem:[%s1984_s2] ss:$0 sm:$0xff] }
  0x21   : > { %690 = vadd.xlane.f32.xlu0 %v689_v1  ;;  %v1598_v38 = vld [vmem:[%s2015_s24] ss:$0 sm:$0xff] }
  0x26   : > { %v1600_v5 = vpop.eup %1599 }
  0x27   : > { %v696_v6 = vmul.f32 32.0, %v1600_v5  ;;  %vm700_vm1 = vweird.f32 %v1600_v5 }
  0x29   : > { %693 = vadd.xlane.f32.xlu0 %v692_v3  ;;  %v697_v7 = vsub.f32 1.0, %v696_v6 }
  0x2b   : > { %v698_v8 = vmul.f32 %v1600_v5, %v697_v7 }
  0x2d   : > { %v699_v9 = vadd.f32 %v1600_v5, %v698_v8 }
  0x2f   : > { %v701_v10 = vsel %vm700_vm1, %v1600_v5, %v699_v9 }
  0x94   : > { %v691_v11 = vpop.xlane.xlu0 %690 }
  0x95   : > { %v702_v12 = vmul.f32 %v701_v10, %v691_v11 }
  0x97   : > { %v704_v13 = vsub.f32 %v684_v0, %v702_v12 }
  0x99   : > { %v706_v14 = vmul.f32 %v704_v13, %v704_v13 }
  0x9b   : > { %v708_v15 = vsel %vm688_vm0, %v706_v14, 0.0 }
  0x9c   : > { %709 = vadd.xlane.f32.xlu1 %v708_v15  ;;  %v694_v16 = vpop.xlane.xlu0 %693 }
  0x9d   : > { %v703_v17 = vmul.f32 %v701_v10, %v694_v16 }
  0x9f   : > { %v705_v18 = vsub.f32 %v685_v2, %v703_v17 }
  0xa1   : > { %v707_v19 = vmul.f32 %v705_v18, %v705_v18 }
  0xa3   : > { %v711_v20 = vsel %vm688_vm0, %v707_v19, 0.0 }
  0xa4   : > { %712 = vadd.xlane.f32.xlu1 %v711_v20 }
 0x10f   : > { %v710_v21 = vpop.xlane.xlu1 %709 }
 0x110   : > { %v714_v22 = vmul.f32 %v710_v21, %v701_v10 }
 0x112   : > { %v716_v23 = vadd.f32 1e-12, %v714_v22 }
 0x114   : > { %1601 = vrsqrt.f32 %v716_v23  ;;  %vm724_vm3 = vweird.f32 %v716_v23 }
 0x117   : > { %v713_v24 = vpop.xlane.xlu1 %712 }
 0x118   : > { %v715_v25 = vmul.f32 %v713_v24, %v701_v10 }
 0x11a   : > { %v1602_v26 = vpop.eup %1601  ;;  %v717_v27 = vadd.f32 1e-12, %v715_v25 }
 0x11b   : > { %v719_v28 = vmul.f32 %v1602_v26, %v716_v23  ;;  %vm725_vm2 = vweird.f32 %v1602_v26 }
 0x11c   : > { %1603 = vrsqrt.f32 %v717_v27  ;;  %vm726_vm4 = vmor %vm724_vm3, %vm725_vm2  ;;  %vm734_vm6 = vweird.f32 %v717_v27 }
 0x11d   : > { %v720_v29 = vmul.f32 %v1602_v26, %v719_v28 }
 0x11f   : > { %v721_v30 = vmul.f32 0.5, %v720_v29 }
 0x121   : > { %v722_v31 = vsub.f32 1.5, %v721_v30 }
 0x122   : > { %v1604_v32 = vpop.eup %1603 }
 0x123   : > { %v723_v33 = vmul.f32 %v1602_v26, %v722_v31  ;;  %v729_v34 = vmul.f32 %v1604_v32, %v717_v27  ;;  %vm735_vm5 = vweird.f32 %v1604_v32 }
 0x124   : > { %vm736_vm7 = vmor %vm734_vm6, %vm735_vm5 }
 0x125   : > { %v727_v36 = vsel %vm726_vm4, %v1602_v26, %v723_v33  ;;  %v730_v37 = vmul.f32 %v1604_v32, %v729_v34 }
 0x126   : > { %v738_v39 = vmul.f32 %v727_v36, %v704_v13 }
 0x127   : > { %v731_v40 = vmul.f32 0.5, %v730_v37 }
 0x128   : > { %v743_v41 = vmul.f32 %v1597_v35, %v738_v39 }
 0x129   : > { %v732_v42 = vsub.f32 1.5, %v731_v40 }
 0x12a   : > { %v748_v43 = vadd.f32 %v1598_v38, %v743_v41 }
 0x12b   : > { %v733_v44 = vmul.f32 %v1604_v32, %v732_v42 }
 0x12c   : > { %750 = vst.msk [vmem:[#allocation2] sm:$0xff] %vm688_vm0, %v748_v43 }
 0x12d   : > { %v737_v45 = vsel %vm736_vm7, %v1604_v32, %v733_v44 }
 0x12e   : > { %v739_v46 = vmul.f32 %v737_v45, %v705_v18 }
 0x130   : > { %v744_v47 = vmul.f32 %v1597_v35, %v739_v46 }
 0x132   : > { %v749_v48 = vadd.f32 %v1598_v38, %v744_v47 }
 0x134   : > { %751 = vst.msk [vmem:[#allocation2 + $0x8] sm:$0xff] %vm688_vm0, %v749_v48 }
 0x135 PF: > { %v1572_v49 = vld [vmem:[%s1773_s30 + $0x8] sm:$0xff]  ;;  %v1571_v50 = vld [vmem:[%s1773_s30] sm:$0xff]  ;;  %vm775_vm8 = vcmask 261120   ;;  %s2016_s17 = scalar_lea.vmem %s1987_s5, %s1763_s23  ;;  %s1659_s30 = smov 64   ;;  %vm798_vm9 = vcmask 130048   ;;  %vm860_vm10 = vcmask 64512  }
 0x136   : > { %v1840_v51 = vld [vmem:[#allocation2] sm:$0xff]  ;;  %785 = vmatpush.bf16.msra.mxu0 %v1572_v49  ;;  %s1660_s18 = smov 96   ;;  %s1661_s20 = smov 80   ;;  %vm1275_vm2 = vcmask 523264  }
 0x137   : > { %v1610_v54 = vld [vmem:[%s2016_s17] ss:$0 sm:$0xff]  ;;  %s1662_s27 = smov 112   ;;  %s2017_s26 = sld [smem:[#allocation6_spill]] }
 0x138   : > { %s1663_s0 = smov 48   ;;  %s2018_s17 = sld [smem:[#allocation4_spill]] }
 0x139   : > { %s2020_s16 = scalar_lea.vmem %s1990_s8, %s1763_s23  ;;  %p1564_p5 = scmp.ne.s32.totalorder %s1757_s22, 1 }
 0x13a   : > { %786 = vmatpush.bf16.msra.mxu0 %v1571_v50 }
 0x13b   : > { %v1842_v52 = vld [vmem:[#allocation2 + $0x8] sm:$0xff] }
 0x13c   : > { %v754_v53 = vpack.c.bf16 %v1842_v52, %v1840_v51 }
 0x13d   : > { %v1611_v62 = vld [vmem:[%s2017_s26] ss:$0 sm:$0xff]  ;;  %v1612_v20 = vld [vmem:[%s2017_s26 + $0x1] ss:$0 sm:$0xff] }
 0x13e   : > { %1516 = vmatmul.msk.bf16.vlgmr.msra.gmra.mxu0 %vm775_vm8, %v754_v53 }
 0x1bb   : > { %v788_v55 = vpop.f32.mrf.mxu0 }
 0x1bc   : > { %v1852_v56 = vadd.f32 %v1610_v54, %v788_v55 }
 0x1be   : > { %883 = vrot.lane.b32.xlu2 %v1852_v56, %s1659_s30  ;;  %796 = vrot.lane.b32.xlu0 %v1852_v56, %s1660_s18 }
 0x1c3   : > { %v790_v57 = vpop.f32.mrf.mxu0 }
 0x1c4   : > { %v1859_v58 = vadd.f32 %v1610_v54, %v790_v57 }
 0x1c6   : > { %937 = vrot.lane.b32.xlu2 %v1852_v56, %s1661_s20 }
 0x1ce   : > { %965 = vrot.lane.b32.xlu2 %v1859_v58, %s1661_s20 }
 0x1d6   : > { %935 = vrot.lane.b32.xlu2 %v1852_v56, %s1662_s27 }
 0x1de   : > { %963 = vrot.lane.b32.xlu2 %v1859_v58, %s1662_s27  ;;  %s2019_s27 = scalar_lea.vmem %s1989_s7, %s1763_s23 }
 0x218   : > { %v884_v59 = vpop.permute.xlu2 %883 }
 0x220   : > { %v938_v61 = vpop.permute.xlu2 %937 }
 0x228   : > { %v966_v10 = vpop.permute.xlu2 %965 }
 0x230   : > { %v797_v60 = vpop.permute.xlu0 %796  ;;  %v936_v12 = vpop.permute.xlu2 %935 }
 0x231   : > { %1517 = vmatpush.xpose.msk.msra.mxu1 %vm798_vm9, %v797_v60 }
 0x234   : > { %1518 = vmatmul.msk.f32.vlgmr.msra.gmra.mxu1 %vm798_vm9, %v1852_v56 }
 0x235   : > { %904 = vmatpush.msrb.mxu1 %v884_v59 }
 0x237   : > { %1523 = vmatpush.xpose.msk.msra.mxu1 %vm798_vm9, %v938_v61 }
 0x238   : > { %v964_v14 = vpop.permute.xlu2 %963 }
 0x2b1   : > { %v820_v63 = vpop.f32.mrf.mxu1 }
 0x2b2   : > { %v850_v0 = vmul.f32 0.25, %v820_v63  ;;  %v1573_v63 = vld [vmem:[%s2018_s17] sm:$0xff] }
 0x2b4   : > { %v858_v1 = vadd.f32 %v1611_v62, %v850_v0 }
 0x2b6   : > { %v861_v2 = vsel %vm860_vm10, %v858_v1, -inf }
 0x2b7   : > { %862 = vmax.xlane.f32.xlu0 %v861_v2 }
 0x32a   : > { %v863_v3 = vpop.xlane.xlu0 %862 }
 0x32b   : > { %v867_v4 = vsub.f32 %v858_v1, %v863_v3 }
 0x32d   : > { %v869_v5 = vmul.f32 1.442695, %v867_v4 }
 0x32f   : > { %1620 = vpow2.f32 %v869_v5 }
 0x335   : > { %v1621_v6 = vpop.eup %1620 }
 0x336   : > { %v873_v7 = vsel %vm860_vm10, %v1621_v6, 0.0 }
 0x337   : > { %874 = vadd.xlane.f32.xlu1 %v873_v7 }
 0x350   : > { %824 = vrot.lane.b32.xlu1 %v1859_v58, %s1660_s18 }
 0x3aa   : > { %v875_v8 = vpop.xlane.xlu1 %874 }
 0x3ab   : > { %1622 = vrcp.f32 %v875_v8 }
 0x3b1   : > { %v1623_v9 = vpop.eup %1622 }
 0x3b2   : > { %v881_v11 = vmul.f32 %v1623_v9, %v1621_v6  ;;  %v1613_v6 = vld [vmem:[%s2019_s27] ss:$0 sm:$0xff] }
 0x3b4   : > { %1521 = vmatmul.msk.f32.vlgmr.msrb.gmra.mxu1 %vm860_vm10, %v881_v11 }
 0x3bc   : > { %1524 = vmatmul.msk.f32.vlgmr.msra.gmra.mxu1 %vm798_vm9, %v936_v12 }
 0x3c2   : > { %v825_v13 = vpop.permute.xlu1 %824 }
 0x3c3   : > { %1519 = vmatpush.xpose.msk.msra.mxu2 %vm798_vm9, %v825_v13 }
 0x3c6   : > { %1520 = vmatmul.msk.f32.vlgmr.msra.gmra.mxu2 %vm798_vm9, %v1859_v58 }
 0x3c7   : > { %1525 = vmatpush.xpose.msk.msrb.mxu2 %vm798_vm9, %v966_v10 }
 0x3ce   : > { %1526 = vmatmul.msk.f32.vlgmr.msrb.gmra.mxu2 %vm798_vm9, %v964_v14 }
 0x431   : > { %v1882_v15 = vpop.f32.mrf.mxu1 }
 0x439   : > { %v960_v16 = vpop.f32.mrf.mxu1 }
 0x43a   : > { %v991_v17 = vmul.f32 0.25, %v960_v16 }
 0x43c   : > { %v993_v18 = vadd.f32 %v1611_v62, %v991_v17 }
 0x43e   : > { %v995_v19 = vsel %vm860_vm10, %v993_v18, -inf }
 0x43f   : > { %996 = vmax.xlane.f32.xlu2 %v995_v19 }
 0x449   : > { %v847_v21 = vpop.f32.mrf.mxu2 }
 0x44a   : > { %v851_v22 = vmul.f32 0.25, %v847_v21 }
 0x44c   : > { %v859_v23 = vadd.f32 %v1612_v20, %v851_v22 }
 0x44e   : > { %v864_v24 = vsel %vm860_vm10, %v859_v23, -inf }
 0x44f   : > { %865 = vmax.xlane.f32.xlu1 %v864_v24 }
 0x451   : > { %v988_v25 = vpop.f32.mrf.mxu2 }
 0x452   : > { %v992_v26 = vmul.f32 0.25, %v988_v25 }
 0x454   : > { %v994_v27 = vadd.f32 %v1612_v20, %v992_v26 }
 0x456   : > { %v998_v28 = vsel %vm860_vm10, %v994_v27, -inf }
 0x457   : > { %1017 = vrot.lane.b32.xlu2 %v1852_v56, %s1663_s0  ;;  %999 = vmax.xlane.f32.xlu0 %v998_v28 }
 0x4b2   : > { %v997_v29 = vpop.xlane.xlu2 %996 }
 0x4b3   : > { %v1001_v32 = vsub.f32 %v993_v18, %v997_v29 }
 0x4b5   : > { %v1003_v34 = vmul.f32 1.442695, %v1001_v32 }
 0x4ba   : > { %v1018_v53 = vpop.permute.xlu2 %1017 }
 0x4c2   : > { %v866_v30 = vpop.xlane.xlu1 %865 }
 0x4c3   : > { %v868_v31 = vsub.f32 %v859_v23, %v866_v30  ;;  %v1576_v30 = vld [vmem:[%s1795_s4 + $0x8] sm:$0xff] }
 0x4c4   : > { %1212 = vmatpush.bf16.msrb.mxu0 %v1576_v30 }
 0x4c5   : > { %v871_v33 = vmul.f32 1.442695, %v868_v31 }
 0x4c7   : > { %1624 = vpow2.f32 %v871_v33  ;;  %v1575_v33 = vld [vmem:[%s1795_s4] sm:$0xff] }
 0x4c8   : > { %1626 = vpow2.f32 %v1003_v34  ;;  %1213 = vmatpush.bf16.msrb.mxu0 %v1575_v33 }
 0x4ca   : > { %v1000_v35 = vpop.xlane.xlu0 %999 }
 0x4cb   : > { %v1002_v36 = vsub.f32 %v994_v27, %v1000_v35 }
 0x4cd   : > { %v1625_v37 = vpop.eup %1624  ;;  %v1005_v38 = vmul.f32 1.442695, %v1002_v36 }
 0x4ce   : > { %v876_v39 = vsel %vm860_vm10, %v1625_v37, 0.0  ;;  %v1627_v40 = vpop.eup %1626 }
 0x4cf   : > { %1628 = vpow2.f32 %v1005_v38  ;;  %877 = vadd.xlane.f32.xlu0 %v876_v39  ;;  %v1007_v43 = vsel %vm860_vm10, %v1627_v40, 0.0 }
 0x4d5   : > { %v1629_v41 = vpop.eup %1628 }
 0x4d6   : > { %v1010_v42 = vsel %vm860_vm10, %v1629_v41, 0.0 }
 0x4d7   : > { %1011 = vadd.xlane.f32.xlu1 %v1010_v42  ;;  %1008 = vadd.xlane.f32.xlu0 %v1007_v43 }
 0x4eb   : > { %909 = vrot.lane.b32.xlu0 %v1859_v58, %s1659_s30  ;;  %s1664_s30 = smov 16  }
 0x4f0   : > { %1043 = vrot.lane.b32.xlu1 %v1859_v58, %s1663_s0  ;;  %v1574_v58 = vld [vmem:[%s2018_s17 + $0x8] sm:$0xff]  ;;  %s2021_s0 = scalar_lea.vmem %s1991_s9, %s1763_s23 }
 0x4f1   : > { %1109 = vmatpush.bf16.msra.mxu2 %v1574_v58  ;;  %v1615_v58 = vld [vmem:[%s2021_s0] ss:$0 sm:$0xff] }
 0x4f5   : > { %1110 = vmatpush.bf16.msra.mxu2 %v1573_v63  ;;  %v1580_v63 = vld [vmem:[%s1805_s21 + $0x18] sm:$0xff] }
 0x542   : > { %v878_v44 = vpop.xlane.xlu0 %877 }
 0x543   : > { %1630 = vrcp.f32 %v878_v44 }
 0x549   : > { %v1631_v47 = vpop.eup %1630 }
 0x54a   : > { %v1009_v45 = vpop.xlane.xlu0 %1008  ;;  %v1012_v46 = vpop.xlane.xlu1 %1011  ;;  %v882_v49 = vmul.f32 %v1631_v47, %v1625_v37 }
 0x54b   : > { %1632 = vrcp.f32 %v1012_v46 }
 0x54c   : > { %1634 = vrcp.f32 %v1009_v45 }
 0x551   : > { %v1633_v50 = vpop.eup %1632 }
 0x552   : > { %v1635_v54 = vpop.eup %1634  ;;  %v1016_v55 = vmul.f32 %v1633_v50, %v1629_v41 }
 0x553   : > { %v1015_v57 = vmul.f32 %v1635_v54, %v1627_v40 }
 0x55d   : > { %v910_v48 = vpop.permute.xlu0 %909 }
 0x55e   : > { %930 = vmatpush.msra.mxu3 %v910_v48 }
 0x55f   : > { %1522 = vmatmul.msk.f32.vlgmr.msra.gmra.mxu3 %vm860_vm10, %v882_v49 }
 0x560   : > { %1038 = vmatpush.msrb.mxu3 %v1018_v53  ;;  %v1614_v53 = vld [vmem:[%s2020_s16] ss:$0 sm:$0xff] }
 0x562   : > { %v1044_v56 = vpop.permute.xlu1 %1043  ;;  %1283 = vmatpush.bf16.msra.mxu3 %v1580_v63  ;;  %v1619_v63 = vld [vmem:[%s678_s3] ss:$0 sm:$0xff] }
 0x563   : > { %1064 = vmatpush.msrb.mxu1 %v1044_v56 }
 0x564   : > { %1528 = vmatmul.msk.f32.vlgmr.msrb.gmra.mxu1 %vm860_vm10, %v1016_v55 }
 0x567   : > { %1527 = vmatmul.msk.f32.vlgmr.msrb.gmra.mxu3 %vm860_vm10, %v1015_v57 }
 0x5e1   : > { %v1066_v60 = vpop.f32.mrf.mxu1 }
 0x5e2   : > { %v932_v59 = vpop.f32.mrf.mxu3 }
 0x5ea   : > { %v1040_v61 = vpop.f32.mrf.mxu3 }
 0x5eb   : > { %v1605_v62 = vpack.i.bf16 %v1066_v60, %v1040_v61 }
 0x5ed   : > { %1606 = vrot.lane.b32.xlu0 %v1605_v62, %s1664_s30 }
 0x65f   : > { %v1607_v0 = vpop.permute.xlu0 %1606 }
 0x660   : > { %v1609_v1 = vunpack.i.h.bf16 %v1607_v0  ;;  %v1608_v2 = vunpack.i.l.bf16 %v1607_v0  ;;  %v1579_v0 = vld [vmem:[%s1805_s21 + $0x10] sm:$0xff] }
 0x661   : > { %1284 = vmatpush.bf16.msra.mxu3 %v1579_v0 }
 0x662   : > { %v1078_v3 = vsel %vm798_vm9, %v932_v59, %v1609_v1  ;;  %v1077_v4 = vsel %vm798_vm9, %v1882_v15, %v1608_v2  ;;  %v1665_v15 = vmov 32.0   ;;  %v1578_v1 = vld [vmem:[%s1805_s21 + $0x8] sm:$0xff]  ;;  %v1616_v2 = vld [vmem:[%s664_s6] ss:$0 sm:$0xff] }
 0x663   : > { %v1079_v5 = vpack.c.bf16 %v1078_v3, %v1077_v4  ;;  %1636 = vrcp.f32 %v1665_v15  ;;  %v1577_v4 = vld [vmem:[%s1805_s21] sm:$0xff] }
 0x665   : > { %1537 = vmatmul.msk.bf16.vlgmr.msra.gmra.mxu2 %vm775_vm8, %v1079_v5  ;;  %1285 = vmatpush.bf16.msra.mxu3 %v1578_v1 }
 0x669   : > { %v1637_v16 = vpop.eup %1636  ;;  %1286 = vmatpush.bf16.msra.mxu3 %v1577_v4 }
 0x66a   : > { %v1128_v17 = vmul.f32 32.0, %v1637_v16  ;;  %vm1132_vm11 = vweird.f32 %v1637_v16 }
 0x66c   : > { %v1129_v18 = vsub.f32 1.0, %v1128_v17 }
 0x66e   : > { %v1130_v19 = vmul.f32 %v1637_v16, %v1129_v18 }
 0x670   : > { %v1131_v20 = vadd.f32 %v1637_v16, %v1130_v19 }
 0x6e8   : > { %v1112_v7 = vpop.f32.mrf.mxu2 }
 0x6e9   : > { %v1113_v8 = vadd.f32 %v1613_v6, %v1112_v7 }
 0x6eb   : > { %v1117_v9 = vadd.f32 %v1113_v8, %v1840_v51  ;;  %v1915_v51 = vsel %vm1132_vm11, %v1637_v16, %v1131_v20 }
 0x6ed   : > { %v1121_v10 = vsel %vm775_vm8, %v1117_v9, 0.0 }
 0x6ee   : > { %1122 = vadd.xlane.f32.xlu0 %v1121_v10 }
 0x6f0   : > { %v1114_v11 = vpop.f32.mrf.mxu2 }
 0x6f1   : > { %v1115_v12 = vadd.f32 %v1613_v6, %v1114_v11 }
 0x6f3   : > { %v1118_v13 = vadd.f32 %v1115_v12, %v1842_v52 }
 0x6f5   : > { %v1124_v14 = vsel %vm775_vm8, %v1118_v13, 0.0 }
 0x6f6   : > { %1125 = vadd.xlane.f32.xlu2 %v1124_v14 }
 0x761   : > { %v1123_v21 = vpop.xlane.xlu0 %1122 }
 0x762   : > { %v1134_v22 = vmul.f32 %v1915_v51, %v1123_v21 }
 0x764   : > { %v1136_v23 = vsub.f32 %v1117_v9, %v1134_v22 }
 0x766   : > { %v1138_v52 = vmul.f32 %v1136_v23, %v1136_v23 }
 0x768   : > { %v1140_v24 = vsel %vm775_vm8, %v1138_v52, 0.0 }
 0x769   : > { %v1126_v25 = vpop.xlane.xlu2 %1125  ;;  %1141 = vadd.xlane.f32.xlu1 %v1140_v24 }
 0x76a   : > { %v1135_v26 = vmul.f32 %v1915_v51, %v1126_v25 }
 0x76c   : > { %v1137_v27 = vsub.f32 %v1118_v13, %v1135_v26  ;;  %v1617_v26 = vld [vmem:[%s672_s25] ss:$0 sm:$0xff] }
 0x76e   : > { %v1139_v28 = vmul.f32 %v1137_v27, %v1137_v27 }
 0x770   : > { %v1143_v29 = vsel %vm775_vm8, %v1139_v28, 0.0 }
 0x771   : > { %1144 = vadd.xlane.f32.xlu0 %v1143_v29 }
 0x7dc   : > { %v1142_v31 = vpop.xlane.xlu1 %1141 }
 0x7dd   : > { %v1146_v32 = vmul.f32 %v1142_v31, %v1915_v51 }
 0x7df   : > { %v1148_v34 = vadd.f32 1e-12, %v1146_v32 }
 0x7e1   : > { %1638 = vrsqrt.f32 %v1148_v34  ;;  %vm1156_vm13 = vweird.f32 %v1148_v34 }
 0x7e4   : > { %v1145_v35 = vpop.xlane.xlu0 %1144 }
 0x7e5   : > { %v1147_v36 = vmul.f32 %v1145_v35, %v1915_v51 }
 0x7e7   : > { %v1639_v37 = vpop.eup %1638  ;;  %v1149_v38 = vadd.f32 1e-12, %v1147_v36 }
 0x7e8   : > { %v1151_v39 = vmul.f32 %v1639_v37, %v1148_v34  ;;  %vm1157_vm12 = vweird.f32 %v1639_v37 }
 0x7e9   : > { %1640 = vrsqrt.f32 %v1149_v38  ;;  %vm1158_vm14 = vmor %vm1156_vm13, %vm1157_vm12  ;;  %vm1166_vm0 = vweird.f32 %v1149_v38 }
 0x7ea   : > { %v1152_v40 = vmul.f32 %v1639_v37, %v1151_v39 }
 0x7ec   : > { %v1153_v41 = vmul.f32 0.5, %v1152_v40 }
 0x7ee   : > { %v1154_v42 = vsub.f32 1.5, %v1153_v41 }
 0x7ef   : > { %v1641_v43 = vpop.eup %1640 }
 0x7f0   : > { %v1155_v44 = vmul.f32 %v1639_v37, %v1154_v42  ;;  %v1161_v45 = vmul.f32 %v1641_v43, %v1149_v38  ;;  %vm1167_vm15 = vweird.f32 %v1641_v43 }
 0x7f1   : > { %vm1168_vm1 = vmor %vm1166_vm0, %vm1167_vm15 }
 0x7f2   : > { %v1162_v46 = vmul.f32 %v1641_v43, %v1161_v45  ;;  %v1159_v47 = vsel %vm1158_vm14, %v1639_v37, %v1155_v44 }
 0x7f3   : > { %v1170_v50 = vmul.f32 %v1159_v47, %v1136_v23 }
 0x7f4   : > { %v1163_v48 = vmul.f32 0.5, %v1162_v46 }
 0x7f5   : > { %v1175_v57 = vmul.f32 %v1614_v53, %v1170_v50 }
 0x7f6   : > { %v1164_v49 = vsub.f32 1.5, %v1163_v48 }
 0x7f7   : > { %v1180_v60 = vadd.f32 %v1615_v58, %v1175_v57 }
 0x7f8   : > { %v1165_v54 = vmul.f32 %v1641_v43, %v1164_v49 }
 0x7fa   : > { %v1169_v55 = vsel %vm1168_vm1, %v1641_v43, %v1165_v54 }
 0x7fb   : > { %v1171_v56 = vmul.f32 %v1169_v55, %v1137_v27 }
 0x7fd   : > { %v1176_v59 = vmul.f32 %v1614_v53, %v1171_v56 }
 0x7ff   : > { %v1181_v61 = vadd.f32 %v1615_v58, %v1176_v59 }
 0x801   : > { %v1182_v62 = vpack.c.bf16 %v1181_v61, %v1180_v60 }
 0x803   : > { %1546 = vmatmul.msk.bf16.vlgmr.msrb.gmra.mxu0 %vm775_vm8, %v1182_v62 }
 0x880   : > { %v1215_v3 = vpop.f32.mrf.mxu0 }
 0x881   : > { %v1216_v5 = vadd.f32 %v1616_v2, %v1215_v3 }
 0x883   : > { %v1220_v6 = vmul.f32 %v1216_v5, %v1216_v5 }
 0x885   : > { %v1222_v7 = vmul.f32 %v1220_v6, %v1216_v5 }
 0x887   : > { %v1224_v8 = vmul.f32 0.044715, %v1222_v7 }
 0x888   : > { %v1217_v9 = vpop.f32.mrf.mxu0 }
 0x889   : > { %v1226_v10 = vadd.f32 %v1224_v8, %v1216_v5  ;;  %v1218_v11 = vadd.f32 %v1616_v2, %v1217_v9 }
 0x88b   : > { %v1228_v12 = vmul.f32 0.7978846, %v1226_v10  ;;  %v1221_v13 = vmul.f32 %v1218_v11, %v1218_v11 }
 0x88d   : > { %v1223_v14 = vmul.f32 %v1221_v13, %v1218_v11  ;;  %1642 = vtanh.f32 %v1228_v12 }
 0x88f   : > { %v1225_v15 = vmul.f32 0.044715, %v1223_v14 }
 0x891   : > { %v1227_v16 = vadd.f32 %v1225_v15, %v1218_v11 }
 0x893   : > { %v1229_v17 = vmul.f32 0.7978846, %v1227_v16  ;;  %v1643_v18 = vpop.eup %1642 }
 0x894   : > { %v1232_v19 = vadd.f32 1.0, %v1643_v18 }
 0x895   : > { %1644 = vtanh.f32 %v1229_v17 }
 0x896   : > { %v1234_v21 = vmul.f32 0.5, %v1232_v19 }
 0x898   : > { %v1236_v52 = vmul.f32 %v1234_v21, %v1216_v5 }
 0x89b   : > { %v1645_v20 = vpop.eup %1644 }
 0x89c   : > { %v1233_v22 = vadd.f32 1.0, %v1645_v20 }
 0x89e   : > { %v1235_v23 = vmul.f32 0.5, %v1233_v22 }
 0x8a0   : > { %v1237_v24 = vmul.f32 %v1235_v23, %v1218_v11 }
 0x8a2   : > { %v1238_v25 = vpack.c.bf16 %v1237_v24, %v1236_v52 }
 0x8a4   : > { %1563 = vmatmul.msk.bf16.vlgmr.msra.gmra.mxu3 %vm1275_vm2, %v1238_v25 }
 0x927   : > { %v1288_v27 = vpop.f32.mrf.mxu3 }
 0x928   : > { %v1289_v28 = vadd.f32 %v1617_v26, %v1288_v27 }
 0x92a   : > { %v1293_v29 = vadd.f32 %v1289_v28, %v1180_v60 }
 0x92c   : > { %v1297_v30 = vsel %vm775_vm8, %v1293_v29, 0.0 }
 0x92d   : > { %1298 = vadd.xlane.f32.xlu2 %v1297_v30 }
 0x92f   : > { %v1290_v31 = vpop.f32.mrf.mxu3 }
 0x930   : > { %v1291_v32 = vadd.f32 %v1617_v26, %v1290_v31 }
 0x932   : > { %v1294_v33 = vadd.f32 %v1291_v32, %v1181_v61  ;;  %v1618_v61 = vld [vmem:[%s675_s28] ss:$0 sm:$0xff]  ;;  %s2022_s28 = sld [smem:[#allocation10_spill]] (!%p1564_p5) }
 0x934   : > { %v1300_v34 = vsel %vm775_vm8, %v1294_v33, 0.0 }
 0x935   : > { %1301 = vadd.xlane.f32.xlu1 %v1300_v34 }
 0x9a0   : > { %v1299_v35 = vpop.xlane.xlu2 %1298 }
 0x9a1   : > { %v1303_v36 = vmul.f32 %v1299_v35, %v1915_v51 }
 0x9a3   : > { %v1305_v37 = vsub.f32 %v1293_v29, %v1303_v36 }
 0x9a5   : > { %v1307_v38 = vmul.f32 %v1305_v37, %v1305_v37 }
 0x9a7   : > { %v1309_v39 = vsel %vm775_vm8, %v1307_v38, 0.0 }
 0x9a8   : > { %v1302_v40 = vpop.xlane.xlu1 %1301  ;;  %1310 = vadd.xlane.f32.xlu0 %v1309_v39 }
 0x9a9   : > { %v1304_v41 = vmul.f32 %v1302_v40, %v1915_v51 }
 0x9ab   : > { %v1306_v42 = vsub.f32 %v1294_v33, %v1304_v41 }
 0x9ad   : > { %v1308_v43 = vmul.f32 %v1306_v42, %v1306_v42 }
 0x9af   : > { %v1312_v44 = vsel %vm775_vm8, %v1308_v43, 0.0 }
 0x9b0   : > { %1313 = vadd.xlane.f32.xlu2 %v1312_v44 }
 0xa1b   : > { %v1311_v45 = vpop.xlane.xlu0 %1310 }
 0xa1c   : > { %v1315_v46 = vmul.f32 %v1311_v45, %v1915_v51 }
 0xa1e   : > { %v1317_v47 = vadd.f32 1e-12, %v1315_v46 }
 0xa20   : > { %1646 = vrsqrt.f32 %v1317_v47  ;;  %vm1325_vm4 = vweird.f32 %v1317_v47 }
 0xa23   : > { %v1314_v48 = vpop.xlane.xlu2 %1313 }
 0xa24   : > { %v1316_v49 = vmul.f32 %v1314_v48, %v1915_v51 }
 0xa26   : > { %v1647_v50 = vpop.eup %1646  ;;  %v1318_v53 = vadd.f32 1e-12, %v1316_v49 }
 0xa27   : > { %v1320_v54 = vmul.f32 %v1647_v50, %v1317_v47  ;;  %vm1326_vm3 = vweird.f32 %v1647_v50 }
 0xa28   : > { %1648 = vrsqrt.f32 %v1318_v53  ;;  %vm1327_vm5 = vmor %vm1325_vm4, %vm1326_vm3  ;;  %vm1335_vm7 = vweird.f32 %v1318_v53 }
 0xa29   : > { %v1321_v55 = vmul.f32 %v1647_v50, %v1320_v54 }
 0xa2b   : > { %v1322_v56 = vmul.f32 0.5, %v1321_v55 }
 0xa2d   : > { %v1323_v57 = vsub.f32 1.5, %v1322_v56 }
 0xa2e   : > { %v1649_v58 = vpop.eup %1648 }
 0xa2f   : > { %v1324_v59 = vmul.f32 %v1647_v50, %v1323_v57  ;;  %v1330_v60 = vmul.f32 %v1649_v58, %v1318_v53  ;;  %vm1336_vm6 = vweird.f32 %v1649_v58 }
 0xa30   : > { %vm1337_vm9 = vmor %vm1335_vm7, %vm1336_vm6 }
 0xa31   : > { %v1328_v51 = vsel %vm1327_vm5, %v1647_v50, %v1324_v59  ;;  %v1331_v62 = vmul.f32 %v1649_v58, %v1330_v60 }
 0xa32   : > { %v1339_v0 = vmul.f32 %v1328_v51, %v1305_v37 }
 0xa33   : > { %v1332_v1 = vmul.f32 0.5, %v1331_v62 }
 0xa34   : > { %v1344_v2 = vmul.f32 %v1618_v61, %v1339_v0 }
 0xa35   : > { %v1333_v3 = vsub.f32 1.5, %v1332_v1 }
 0xa36   : > { %v1349_v4 = vadd.f32 %v1619_v63, %v1344_v2 }
 0xa37   : > { %v1334_v5 = vmul.f32 %v1649_v58, %v1333_v3 }
 0xa38   : > { %1351 = vst.msk [vmem:[#allocation2] sm:$0xff] %vm775_vm8, %v1349_v4 }
 0xa39   : > { %v1338_v6 = vsel %vm1337_vm9, %v1649_v58, %v1334_v5 }
 0xa3a   : > { %v1340_v7 = vmul.f32 %v1338_v6, %v1306_v42 }
 0xa3c   : > { %v1345_v8 = vmul.f32 %v1618_v61, %v1340_v7  ;;  %1356 = sbr.rel (%p1564_p5) target bundleno = 2627 (0xa43), region = 92 }
 0xa3e   : > { %v1350_v9 = vadd.f32 %v1619_v63, %v1345_v8 }
 0xa40   : > { %1352 = vst.msk [vmem:[#allocation2 + $0x8] sm:$0xff] %vm775_vm8, %v1350_v9 }
 0xa41   : > { %1357 = vst.msk [vmem:[%s2022_s28] sm:$0xff] %vm775_vm8, %v1349_v4 }
 0xa42   : > { %1358 = vst.msk [vmem:[%s2022_s28 + $0x8] sm:$0xff] %vm775_vm8, %v1350_v9 }
 0xa43 PF: > { %s2023_s16 = sld [smem:[#allocation3_spill]] }
 0xa49   : > { %s26_s21 = sadd.s32 1, %s2023_s16  }
 0xa4a   : > { %p23_p6 = scmp.ge.s32.totalorder %s26_s21, 4  }
 0xa4c   :  { %25 = sbr.rel (!%p23_p6) target bundleno = 7 (0x7), region = 151 }

</bundles_post_ra>
